<compile_context>
chip_gen: v5e
topology: v5e:2x2
jax: 0.10.0
libtpu: 0.0.40
codegen_flags: <defaults>
</compile_context>

<pallas_src>
import jax
import jax.numpy as jnp
from jax.experimental import pallas as pl
from jax.experimental.pallas import tpu as pltpu


def _mnet_kernel(x_ref, w_ref, b_ref, o_ref):
    # x_ref: (C_in, T, hw_tile)  -- all temporal frames for this (n, hw) tile
    # w_ref: (2, C_out, C_in)    -- conv taps: [0] -> frame 2t, [1] -> frame 2t+1
    # b_ref: (C_out, 1)
    # o_ref: (C_out, hw_tile)    -- lane-dense output tile
    t_frames = x_ref.shape[1]
    t_out = t_frames // 2
    w0 = w_ref[0]                      # (C_out, C_in)
    w1 = w_ref[1]                      # (C_out, C_in)

    def conv_frame(t):                 # t is a Python int (static, unrolled)
        y = jnp.dot(w0, x_ref[:, 2 * t, :], preferred_element_type=jnp.float32)
        y = y + jnp.dot(w1, x_ref[:, 2 * t + 1, :],
                        preferred_element_type=jnp.float32)
        return y                       # f32 accumulation

    acc = conv_frame(0)
    for t in range(1, t_out):          # T_out is small & static -> fully unrolled
        acc = jnp.maximum(acc, conv_frame(t))

    # Bias is invariant under the temporal max -> added exactly once at the end.
    o_ref[...] = (acc + b_ref[...]).astype(o_ref.dtype)


def _pick_hw_tiling(hw, n_batch, c_in, t, c_out, itemsize,
                    vmem_budget_bytes=12 * 1024 * 1024, lane_cap=32768):
    """Pick the hw (lane) tile width.  Returns (hw_tile, num_hw_blocks)."""
    # VMEM per hw lane: double-buffered input block + double-buffered output block.
    per_lane = (2 * c_in * t + 2 * c_out) * itemsize
    cap = max(128, min(lane_cap, vmem_budget_bytes // max(per_lane, 1)))
    cap = (cap // 128) * 128

    def largest_div(limit):
        start = (min(limit, hw) // 128) * 128
        for cand in range(start, 0, -128):
            if hw % cand == 0:
                return cand
        return None

    if hw % 128 == 0:
        tile = largest_div(cap) or 128
        # v7x megacore: keep >= 2 parallel work units when possible.
        if n_batch * (hw // tile) < 2 and hw >= 2048:
            smaller = largest_div(hw // 2)
            if smaller is not None:
                tile = smaller
        return tile, hw // tile

    # HW not a multiple of 128: single full-width block if it fits (masked
    # stores, but only one block), otherwise 128-multiple tiles with a clipped
    # tail block (Pallas pads the boundary block; garbage lanes never mix
    # across lanes in this op and are not written back).
    if hw <= cap:
        return hw, 1
    return cap, pl.cdiv(hw, cap)


def mnet_forward(chirp_maps, weight, bias, *, vmem_budget_bytes=12 * 1024 * 1024):
    """MNet forward.

    chirp_maps: (N, C_in, T, H, W);  weight: (C_out, C_in, 2, 1, 1);  bias: (C_out,)
    returns:    (N, C_out, 1, H, W)
    """
    N, C_in, T, H, W = chirp_maps.shape
    C_out = weight.shape[0]
    assert T % 2 == 0, "temporal dim must be even"
    HW = H * W

    # ---- free views / tiny repacks only (no HBM transpose of the activations) ----
    x = chirp_maps.reshape(N, C_in, T, HW)                    # free view
    w = jnp.transpose(weight[:, :, :, 0, 0], (2, 0, 1))       # (2, C_out, C_in), tiny
    b = bias.reshape(C_out, 1)

    itemsize = jnp.dtype(chirp_maps.dtype).itemsize
    hw_tile, n_hw_blocks = _pick_hw_tiling(
        HW, N, C_in, T, C_out, itemsize, vmem_budget_bytes=vmem_budget_bytes)
    grid = (N, n_hw_blocks)

    out = pl.pallas_call(
        _mnet_kernel,
        out_shape=jax.ShapeDtypeStruct((N, C_out, HW), chirp_maps.dtype),
        grid_spec=pltpu.PrefetchScalarGridSpec(
            num_scalar_prefetch=0,
            grid=grid,
            in_specs=[
                # One contiguous (C_in, T, hw_tile) slab per grid step.
                pl.BlockSpec((None, C_in, T, hw_tile), lambda n, i: (n, 0, 0, i)),
                # Stacked conv taps; constant block index -> fetched once.
                pl.BlockSpec((2, C_out, C_in), lambda n, i: (0, 0, 0)),
                pl.BlockSpec((C_out, 1), lambda n, i: (0, 0)),
            ],
            out_specs=pl.BlockSpec((None, C_out, hw_tile), lambda n, i: (n, 0, i)),
        ),
        compiler_params=pltpu.CompilerParams(
            dimension_semantics=("parallel", "parallel"),
            vmem_limit_bytes=32 * 1024 * 1024,   # safe on v5e/v6e/v7x; > v5e 16MiB default
        ),
    )(x, w, b)

    # ---- free reshape back to the PyTorch layout (N, C_out, 1, H, W) ----
    return out.reshape(N, C_out, 1, H, W)


def _reference(chirp_maps, weight, bias):
    """Pure-JAX reference of the PyTorch forward (conv3d (2,1,1)/s2 + temporal maxpool)."""
    N, C_in, T, H, W = chirp_maps.shape
    C_out = weight.shape[0]
    T_out = T // 2
    x = chirp_maps.reshape(N, C_in, T_out, 2, H, W)   # x[n,c,t,k,h,w] = in[n,c,2t+k,h,w]
    w = weight.reshape(C_out, C_in, 2)
    conv = jnp.einsum("nctkhw,ock->nothw", x, w)
    conv = conv + bias[None, :, None, None, None]
    return jnp.max(conv, axis=2, keepdims=True)


if __name__ == "__main__":
    key = jax.random.PRNGKey(0)
    k_x, k_w, k_b = jax.random.split(key, 3)

    N, C_in, C_out, T, H, W = 2, 4, 8, 8, 16, 16      # numFrames = 8

    chirp_maps = jax.random.normal(k_x, (N, C_in, T, H, W), dtype=jnp.float32)
    weight = jax.random.normal(k_w, (C_out, C_in, 2, 1, 1), dtype=jnp.float32) * 0.1
    bias = jax.random.normal(k_b, (C_out,), dtype=jnp.float32) * 0.1

    out = jax.block_until_ready(mnet_forward(chirp_maps, weight, bias))
    ref = _reference(chirp_maps, weight, bias)

    assert out.shape == (N, C_out, 1, H, W), out.shape
    assert jnp.allclose(out, ref, atol=1e-4, rtol=1e-4)

    print("KERNEL_OK")
</pallas_src>

<mosaic_0001>
module attributes {stable_mosaic.version = 11 : i64} {
  func.func @_mnet_kernel(%arg0: i32, %arg1: i32, %arg2: memref<1x4x8x256xf32, #tpu.memory_space<vmem>>, %arg3: memref<2x8x4xf32, #tpu.memory_space<vmem>>, %arg4: memref<8x1xf32, #tpu.memory_space<vmem>>, %arg5: memref<1x8x256xf32, #tpu.memory_space<vmem>>) attributes {dimension_semantics = [#tpu.dimension_semantics<parallel>, #tpu.dimension_semantics<parallel>], iteration_bounds = array<i64: 2, 1>, scalar_prefetch = 0 : i64, scratch_operands = 0 : i64, tpu.core_type = #tpu.core_type<tc>, window_params = [{transform_indices = @transform_0, window_bounds = array<i64: 1, 4, 8, 256>}, {pipeline_mode = #tpu.pipeline_mode<synchronous>, transform_indices = @transform_1, window_bounds = array<i64: 2, 8, 4>}, {pipeline_mode = #tpu.pipeline_mode<synchronous>, transform_indices = @transform_2, window_bounds = array<i64: 8, 1>}, {transform_indices = @transform_3, window_bounds = array<i64: 1, 8, 256>}]} {
    %c0 = arith.constant 0 : index
    %c0_0 = arith.constant 0 : index
    %c0_1 = arith.constant 0 : index
    %0 = vector.load %arg3[%c0, %c0_0, %c0_1] : memref<2x8x4xf32, #tpu.memory_space<vmem>>, vector<1x8x4xf32>
    %1 = vector.shape_cast %0 : vector<1x8x4xf32> to vector<8x4xf32>
    %c1 = arith.constant 1 : index
    %c0_2 = arith.constant 0 : index
    %c0_3 = arith.constant 0 : index
    %2 = vector.load %arg3[%c1, %c0_2, %c0_3] : memref<2x8x4xf32, #tpu.memory_space<vmem>>, vector<1x8x4xf32>
    %3 = vector.shape_cast %2 : vector<1x8x4xf32> to vector<8x4xf32>
    %c0_4 = arith.constant 0 : index
    %c0_5 = arith.constant 0 : index
    %c0_6 = arith.constant 0 : index
    %c0_7 = arith.constant 0 : index
    %4 = vector.load %arg2[%c0_4, %c0_5, %c0_6, %c0_7] : memref<1x4x8x256xf32, #tpu.memory_space<vmem>>, vector<1x4x1x256xf32>
    %5 = vector.shape_cast %4 : vector<1x4x1x256xf32> to vector<4x256xf32>
    %cst = arith.constant dense<0.000000e+00> : vector<8x256xf32>
    %6 = tpu.matmul %1, %5, %cst {dimension_numbers = #tpu.dot_dimension_numbers<[1], [0], [0], [1], [0, 0, 1, 1], [], []>} : vector<8x4xf32>, vector<4x256xf32>, vector<8x256xf32> -> vector<8x256xf32>
    %c0_8 = arith.constant 0 : index
    %c0_9 = arith.constant 0 : index
    %c1_10 = arith.constant 1 : index
    %c0_11 = arith.constant 0 : index
    %7 = vector.load %arg2[%c0_8, %c0_9, %c1_10, %c0_11] : memref<1x4x8x256xf32, #tpu.memory_space<vmem>>, vector<1x4x1x256xf32>
    %8 = vector.shape_cast %7 : vector<1x4x1x256xf32> to vector<4x256xf32>
    %cst_12 = arith.constant dense<0.000000e+00> : vector<8x256xf32>
    %9 = tpu.matmul %3, %8, %cst_12 {dimension_numbers = #tpu.dot_dimension_numbers<[1], [0], [0], [1], [0, 0, 1, 1], [], []>} : vector<8x4xf32>, vector<4x256xf32>, vector<8x256xf32> -> vector<8x256xf32>
    %10 = arith.addf %6, %9 : vector<8x256xf32>
    %c0_13 = arith.constant 0 : index
    %c0_14 = arith.constant 0 : index
    %c2 = arith.constant 2 : index
    %c0_15 = arith.constant 0 : index
    %11 = vector.load %arg2[%c0_13, %c0_14, %c2, %c0_15] : memref<1x4x8x256xf32, #tpu.memory_space<vmem>>, vector<1x4x1x256xf32>
    %12 = vector.shape_cast %11 : vector<1x4x1x256xf32> to vector<4x256xf32>
    %cst_16 = arith.constant dense<0.000000e+00> : vector<8x256xf32>
    %13 = tpu.matmul %1, %12, %cst_16 {dimension_numbers = #tpu.dot_dimension_numbers<[1], [0], [0], [1], [0, 0, 1, 1], [], []>} : vector<8x4xf32>, vector<4x256xf32>, vector<8x256xf32> -> vector<8x256xf32>
    %c0_17 = arith.constant 0 : index
    %c0_18 = arith.constant 0 : index
    %c3 = arith.constant 3 : index
    %c0_19 = arith.constant 0 : index
    %14 = vector.load %arg2[%c0_17, %c0_18, %c3, %c0_19] : memref<1x4x8x256xf32, #tpu.memory_space<vmem>>, vector<1x4x1x256xf32>
    %15 = vector.shape_cast %14 : vector<1x4x1x256xf32> to vector<4x256xf32>
    %cst_20 = arith.constant dense<0.000000e+00> : vector<8x256xf32>
    %16 = tpu.matmul %3, %15, %cst_20 {dimension_numbers = #tpu.dot_dimension_numbers<[1], [0], [0], [1], [0, 0, 1, 1], [], []>} : vector<8x4xf32>, vector<4x256xf32>, vector<8x256xf32> -> vector<8x256xf32>
    %17 = arith.addf %13, %16 : vector<8x256xf32>
    %18 = arith.maximumf %10, %17 : vector<8x256xf32>
    %c0_21 = arith.constant 0 : index
    %c0_22 = arith.constant 0 : index
    %c4 = arith.constant 4 : index
    %c0_23 = arith.constant 0 : index
    %19 = vector.load %arg2[%c0_21, %c0_22, %c4, %c0_23] : memref<1x4x8x256xf32, #tpu.memory_space<vmem>>, vector<1x4x1x256xf32>
    %20 = vector.shape_cast %19 : vector<1x4x1x256xf32> to vector<4x256xf32>
    %cst_24 = arith.constant dense<0.000000e+00> : vector<8x256xf32>
    %21 = tpu.matmul %1, %20, %cst_24 {dimension_numbers = #tpu.dot_dimension_numbers<[1], [0], [0], [1], [0, 0, 1, 1], [], []>} : vector<8x4xf32>, vector<4x256xf32>, vector<8x256xf32> -> vector<8x256xf32>
    %c0_25 = arith.constant 0 : index
    %c0_26 = arith.constant 0 : index
    %c5 = arith.constant 5 : index
    %c0_27 = arith.constant 0 : index
    %22 = vector.load %arg2[%c0_25, %c0_26, %c5, %c0_27] : memref<1x4x8x256xf32, #tpu.memory_space<vmem>>, vector<1x4x1x256xf32>
    %23 = vector.shape_cast %22 : vector<1x4x1x256xf32> to vector<4x256xf32>
    %cst_28 = arith.constant dense<0.000000e+00> : vector<8x256xf32>
    %24 = tpu.matmul %3, %23, %cst_28 {dimension_numbers = #tpu.dot_dimension_numbers<[1], [0], [0], [1], [0, 0, 1, 1], [], []>} : vector<8x4xf32>, vector<4x256xf32>, vector<8x256xf32> -> vector<8x256xf32>
    %25 = arith.addf %21, %24 : vector<8x256xf32>
    %26 = arith.maximumf %18, %25 : vector<8x256xf32>
    %c0_29 = arith.constant 0 : index
    %c0_30 = arith.constant 0 : index
    %c6 = arith.constant 6 : index
    %c0_31 = arith.constant 0 : index
    %27 = vector.load %arg2[%c0_29, %c0_30, %c6, %c0_31] : memref<1x4x8x256xf32, #tpu.memory_space<vmem>>, vector<1x4x1x256xf32>
    %28 = vector.shape_cast %27 : vector<1x4x1x256xf32> to vector<4x256xf32>
    %cst_32 = arith.constant dense<0.000000e+00> : vector<8x256xf32>
    %29 = tpu.matmul %1, %28, %cst_32 {dimension_numbers = #tpu.dot_dimension_numbers<[1], [0], [0], [1], [0, 0, 1, 1], [], []>} : vector<8x4xf32>, vector<4x256xf32>, vector<8x256xf32> -> vector<8x256xf32>
    %c0_33 = arith.constant 0 : index
    %c0_34 = arith.constant 0 : index
    %c7 = arith.constant 7 : index
    %c0_35 = arith.constant 0 : index
    %30 = vector.load %arg2[%c0_33, %c0_34, %c7, %c0_35] : memref<1x4x8x256xf32, #tpu.memory_space<vmem>>, vector<1x4x1x256xf32>
    %31 = vector.shape_cast %30 : vector<1x4x1x256xf32> to vector<4x256xf32>
    %cst_36 = arith.constant dense<0.000000e+00> : vector<8x256xf32>
    %32 = tpu.matmul %3, %31, %cst_36 {dimension_numbers = #tpu.dot_dimension_numbers<[1], [0], [0], [1], [0, 0, 1, 1], [], []>} : vector<8x4xf32>, vector<4x256xf32>, vector<8x256xf32> -> vector<8x256xf32>
    %33 = arith.addf %29, %32 : vector<8x256xf32>
    %34 = arith.maximumf %26, %33 : vector<8x256xf32>
    %c0_37 = arith.constant 0 : index
    %c0_38 = arith.constant 0 : index
    %35 = vector.load %arg4[%c0_37, %c0_38] : memref<8x1xf32, #tpu.memory_space<vmem>>, vector<8x1xf32>
    %36 = vector.broadcast %35 : vector<8x1xf32> to vector<8x256xf32>
    %37 = arith.addf %34, %36 : vector<8x256xf32>
    %c0_39 = arith.constant 0 : index
    %c0_40 = arith.constant 0 : index
    %c0_41 = arith.constant 0 : index
    %38 = vector.load %arg5[%c0_39, %c0_40, %c0_41] : memref<1x8x256xf32, #tpu.memory_space<vmem>>, vector<1x8x256xf32>
    %39 = vector.shape_cast %38 : vector<1x8x256xf32> to vector<8x256xf32>
    %40 = vector.shape_cast %37 : vector<8x256xf32> to vector<1x8x256xf32>
    tpu.vector_store %arg5[%c0_39, %c0_40, %c0_41], %40 {strides = array<i32>} : memref<1x8x256xf32, #tpu.memory_space<vmem>>, vector<1x8x256xf32>,
    return
  }
  func.func @transform_0(%arg0: i32, %arg1: i32) -> (i32, i32, i32, i32) {
    %c0_i32 = arith.constant 0 : i32
    %c0_i32_0 = arith.constant 0 : i32
    %c0_i32_1 = arith.constant 0 : i32
    return %arg0, %c0_i32, %c0_i32_0, %arg1 : i32, i32, i32, i32
  }
  func.func @transform_1(%arg0: i32, %arg1: i32) -> (i32, i32, i32) {
    %c0_i32 = arith.constant 0 : i32
    %c0_i32_0 = arith.constant 0 : i32
    %c0_i32_1 = arith.constant 0 : i32
    %c0_i32_2 = arith.constant 0 : i32
    return %c0_i32, %c0_i32_0, %c0_i32_1 : i32, i32, i32
  }
  func.func @transform_2(%arg0: i32, %arg1: i32) -> (i32, i32) {
    %c0_i32 = arith.constant 0 : i32
    %c0_i32_0 = arith.constant 0 : i32
    %c0_i32_1 = arith.constant 0 : i32
    return %c0_i32, %c0_i32_0 : i32, i32
  }
  func.func @transform_3(%arg0: i32, %arg1: i32) -> (i32, i32, i32) {
    %c0_i32 = arith.constant 0 : i32
    %c0_i32_0 = arith.constant 0 : i32
    return %arg0, %c0_i32, %arg1 : i32, i32, i32
  }
}

</mosaic_0001>

<bundles_post_ra>
// kernel: tpu_custom_call.1
= control target key start
LH: loop header
LB: loop body
LE: loop exit
PB: predicated region body
PF: predicated region fallthrough
CT: control target
= control target key end

     0   :  { %8 = vsyncpa [#allocation3], 0  ;;  %s1360_s0 = inlined_call_operand.hbm [shape: f32[2,4,8,256], index: 0, kind: input, shape index: {}]   ;;  %s1361_s1 = inlined_call_operand.vmem [shape: f32[2,8,4], index: 1, kind: input, shape index: {}]   ;;  %s1362_s2 = inlined_call_operand.vmem [shape: f32[8,1], index: 2, kind: input, shape index: {}]   ;;  %s1363_s3 = inlined_call_operand.hbm [shape: f32[2,8,256], index: 3, kind: output, shape index: {}]  }
   0x1   :  { %10 = vsyncpa [#allocation3 + $0x1], 0 }
   0x2   :  { %11 = vsyncpa [#allocation4], 0 }
   0x3   :  { %13 = vsyncpa [#allocation4 + $0x1], 0  ;;  %s1144_s12 = smov 0   ;;  %s1146_s13 = smov 0  }
   0x4   :  { %s1148_s14 = smov 0   ;;  %s1150_s15 = smov 0  }
   0x5   :  { %s1152_s16 = smov 0   ;;  %s1154_s17 = smov 0  }
   0x6 LB: > { %s860_s18 = sadd.s32 4294967295, %s1119_s17   ;;  %s861_s19 = sadd.s32 4294967294, %s1119_s17   ;;  %s1119_s17 = sphi %s1154_s17, %s19_s17   ;;  %s1115_s16 = sphi %s1152_s16, %s1372_s16   ;;  %s1111_s15 = sphi %s1150_s15, %s1371_s15   ;;  %s1107_s14 = sphi %s1148_s14, %s1370_s14   ;;  %s1103_s13 = sphi %s1146_s13, %s1369_s13   ;;  %s1099_s12 = sphi %s1144_s12, %s1368_s12  }
   0x7   : > { %s31_s20 = sadd.s32 1, %s1115_s16  ;;  %s40_s21 = sadd.s32 1, %s1107_s14 }
   0x8   : > { %p33_p0 = scmp.ge.s32.totalorder %s31_s20, 2  ;;  %p47_p1 = scmp.ne.s32.totalorder %s1107_s14, %s1103_s13 }
   0x9   : > { %p48_p2 = scmp.eq.s32.totalorder %s1119_s17, 0  ;;  %p53_p3 = scmp.ne.s32.totalorder %s1103_s13, %s1099_s12 }
   0xa   : > { %s1374_s20 = smov (%p33_p0, %s31_s20), 0  ;;  %p54_p5 = scmp.eq.s32.totalorder %s860_s18, 0 }
   0xb   : > { %p1185_p4 = por %p48_p2, %p47_p1  ;;  %s35_s23 = ssub.s32 %s1115_s16, %s1374_s20 }
   0xc   : > { %p121_p6 = scmp.eq.s32.totalorder %s860_s18, 1  ;;  %p38_p7 = scmp.eq.s32.totalorder %s35_s23, 0 }
   0xd   : > { %p1191_p8 = por %p54_p5, %p53_p3  ;;  %p127_p10 = scmp.eq.s32.totalorder %s861_s19, 1 }
   0xe   : > { %p1195_p9 = por %p121_p6, %p47_p1  ;;  %p863_p12 = scmp.ge.s32.totalorder %s1119_s17, 2 }
   0xf   : > { %s1200_s26 = scalar_select %p38_p7, %s1107_s14, %s40_s21  }
  0x10   : > { %p1202_p11 = por %p127_p10, %p53_p3  ;;  %p953_p13 = scmp.lt.s32.totalorder %s1119_s17, 2 }
  0x11   : > { %s153_s28 = sand.u32 1, %s1107_s14   ;;  %s939_s30 = sshll.u32 %s1115_s16, 6 }
  0x12   : > { %s864_s29 = sshll.u32 %s153_s28, 6  ;;  %s164_s6 = scalar_lea.hbm %s1360_s0, %s939_s30 }
  0x13   : > { %s157_s7 = scalar_lea.vmem [#allocation2], %s864_s29  ;;  %s165_s9 = sshll.u32 %s164_s6, 4  ;;  %s166_s9 = int_to_ptr.hbm [resolvable:$true] %s165_s9 }
  0x14   : > { %s167_s8 = sshll.u32 %s157_s7, 4  ;;  %p946_p0 = pnand %p953_p13, %p1185_p4  ;;  %s168_s8 = int_to_ptr.vmem [resolvable:$true] %s167_s8 }
  0x15   : > { %p867_p1 = scmp.ge.s32.totalorder %s1119_s17, 1  ;;  %s154_s10 = scalar_lea.sflag [#allocation3], %s153_s28 }
  0x16   : > { %s1121_s11 = smov 256   ;;  %s1122_s18 = smov 16  }
  0x17   : > { %948 = dma.hbm_to_vmem [thread:$0]  (!%p946_p0), %s166_s9, 1024, %s168_s8, %s154_s10, %s1121_s11, %s1121_s11, %s1122_s18  }
  0x18   : > { %p175_p2 = scmp.lt.s32.totalorder %s1119_s17, 3 }
  0x1a   : > { %p176_p3 = pnand %p867_p1, %p175_p2 }
  0x1b   : > { %s1218_s19 = sand.u32 (!%p176_p3), 1, %s1103_s13  }
  0x1c   : > { %179 = sbr.rel (%p176_p3) target bundleno = 267 (0x10b), region = 32  ;;  %s868_s21 = sshll.u32 (!%p176_p3), %s1218_s19, 6 }
  0x1d   : > { %s182_s23 = scalar_lea.sflag (!%p176_p3), [#allocation3], %s1218_s19  ;;  %s1222_s29 = scalar_lea.vmem (!%p176_p3), [#allocation2], %s868_s21 }
  0x21   : > { %1090 = dma.done.wait (%p1191_p8), %s182_s23, 1024  }
  0x22   : > { %1092 = vsyncadd (%p1191_p8), %s182_s23, 4294966272  ;;  %v874_v0 = vld [vmem:[%s1222_s29 + $0x1] ss:$8 sm:$0x3]  ;;  %vm246_vm0 = vcmask 1043456   ;;  %vm242_vm1 = vcmask 31744  }
  0x23   : > { %v875_v1 = vld [vmem:[%s1222_s29 + $0x11] ss:$8 sm:$0x3]  ;;  %v876_v2 = vld [vmem:[%s1222_s29 + $0x21] ss:$8 sm:$0x3] }
  0x24   : > { %v877_v3 = vld [vmem:[%s1222_s29 + $0x31] ss:$8 sm:$0x3]  ;;  %233 = vst [vmem:[#allocation1] ss:$9 sm:$0xff] %v874_v0  ;;  %v1237_v6 = vld [vmem:[%s1361_s1 + $0x8] sm:$0xff] }
  0x25   : > { %235 = vst [vmem:[#allocation1 + $0x1] ss:$9 sm:$0xff] %v875_v1  ;;  %v214_v4 = vld [vmem:[%s1222_s29] ss:$8 sm:$0x3]  ;;  %v1251_v12 = vld [vmem:[%s1361_s1] sm:$0xff] }
  0x26   : > { %237 = vst [vmem:[#allocation1 + $0x2] ss:$9 sm:$0xff] %v876_v2  ;;  %v871_v5 = vld [vmem:[%s1222_s29 + $0x10] ss:$8 sm:$0x3]  ;;  %v1123_v37 = vmov 0  }
  0x27   : > { %239 = vst [vmem:[#allocation1 + $0x3] ss:$9 sm:$0xff] %v877_v3  ;;  %v872_v7 = vld [vmem:[%s1222_s29 + $0x20] ss:$8 sm:$0x3]  ;;  %v747_v36 = vld [vmem:[%s1362_s2] sm:$0xff]  ;;  %1006 = vset.pattern.permute.xlu0 %v1123_v37 }
  0x28   : > { %v873_v10 = vld [vmem:[%s1222_s29 + $0x30] ss:$8 sm:$0x3]  ;;  %v890_v11 = vld [vmem:[%s1222_s29 + $0x3] ss:$8 sm:$0x3]  ;;  %750 = vperm.xlu0 %1006, %v747_v36  }
  0x29   : > { %v891_v13 = vld [vmem:[%s1222_s29 + $0x13] ss:$8 sm:$0x3]  ;;  %v892_v16 = vld [vmem:[%s1222_s29 + $0x23] ss:$8 sm:$0x3] }
  0x2a   : > { %v893_v17 = vld [vmem:[%s1222_s29 + $0x33] ss:$8 sm:$0x3]  ;;  %v886_v18 = vld [vmem:[%s1222_s29 + $0x2] ss:$8 sm:$0x3] }
  0x2b   : > { %v887_v19 = vld [vmem:[%s1222_s29 + $0x12] ss:$8 sm:$0x3]  ;;  %v888_v20 = vld [vmem:[%s1222_s29 + $0x22] ss:$8 sm:$0x3] }
  0x2c   : > { %v889_v23 = vld [vmem:[%s1222_s29 + $0x32] ss:$8 sm:$0x3]  ;;  %v906_v24 = vld [vmem:[%s1222_s29 + $0x5] ss:$8 sm:$0x3] }
  0x2d   : > { %v907_v25 = vld [vmem:[%s1222_s29 + $0x15] ss:$8 sm:$0x3]  ;;  %v908_v28 = vld [vmem:[%s1222_s29 + $0x25] ss:$8 sm:$0x3] }
  0x2e   : > { %v240_v8 = vld [vmem:[#allocation1] sm:$0xff]  ;;  %v241_v9 = vld [vmem:[#allocation1 + $0x9] sm:$0xff]  ;;  %s869_s6 = sshll.u32 %s1218_s19, 4  ;;  %s940_s7 = sshll.u32 %s1111_s15, 4 }
  0x2f   : > { %295 = vst [vmem:[#allocation1] ss:$9 sm:$0xff] %v214_v4  ;;  %878 = vmatpush.msk.msra.mxu0 %vm246_vm0, %v240_v8  ;;  %880 = vmatpush.msk.msra.mxu1 %vm246_vm0, %v241_v9  ;;  %v909_v29 = vld [vmem:[%s1222_s29 + $0x35] ss:$8 sm:$0x3]  ;;  %s771_s10 = scalar_lea.hbm %s1363_s3, %s940_s7  ;;  %s208_s15 = scalar_lea.vmem [#allocation5], %s869_s6 }
  0x30   : > { %297 = vst [vmem:[#allocation1 + $0x1] ss:$9 sm:$0xff] %v871_v5  ;;  %879 = vmatmul.msk.f32.vlgmr.msra.gmra.mxu0 %vm242_vm1, %v1237_v6  ;;  %881 = vmatmul.msk.f32.vlgmr.msra.gmra.mxu1 %vm242_vm1, %v1237_v6  ;;  %v902_v30 = vld [vmem:[%s1222_s29 + $0x4] ss:$8 sm:$0x3]  ;;  %s773_s11 = sshll.u32 %s208_s15, 4  ;;  %s774_s11 = int_to_ptr.vmem [resolvable:$true] %s773_s11 }
  0x31   : > { %299 = vst [vmem:[#allocation1 + $0x2] ss:$9 sm:$0xff] %v872_v7  ;;  %v903_v31 = vld [vmem:[%s1222_s29 + $0x14] ss:$8 sm:$0x3]  ;;  %s775_s18 = sshll.u32 %s771_s10, 4  ;;  %s776_s18 = int_to_ptr.hbm [resolvable:$true] %s775_s18 }
  0x32   : > { %301 = vst [vmem:[#allocation1 + $0x3] ss:$9 sm:$0xff] %v873_v10  ;;  %v904_v32 = vld [vmem:[%s1222_s29 + $0x24] ss:$8 sm:$0x3]  ;;  %s758_s21 = scalar_lea.sflag [#allocation4], %s1218_s19 }
  0x33   : > { %v905_v35 = vld [vmem:[%s1222_s29 + $0x34] ss:$8 sm:$0x3]  ;;  %v922_v38 = vld [vmem:[%s1222_s29 + $0x7] ss:$8 sm:$0x3] }
  0x34   : > { %v923_v39 = vld [vmem:[%s1222_s29 + $0x17] ss:$8 sm:$0x3]  ;;  %v924_v42 = vld [vmem:[%s1222_s29 + $0x27] ss:$8 sm:$0x3] }
  0x35   : > { %v925_v43 = vld [vmem:[%s1222_s29 + $0x37] ss:$8 sm:$0x3]  ;;  %v918_v44 = vld [vmem:[%s1222_s29 + $0x6] ss:$8 sm:$0x3] }
  0x36   : > { %v919_v45 = vld [vmem:[%s1222_s29 + $0x16] ss:$8 sm:$0x3]  ;;  %v920_v48 = vld [vmem:[%s1222_s29 + $0x26] ss:$8 sm:$0x3] }
  0x37   : > { %v921_v49 = vld [vmem:[%s1222_s29 + $0x36] ss:$8 sm:$0x3]  ;;  %s1051_s23 = sshra.s32 %s776_s18, 4  ;;  %s1057_s28 = scalar_lea.hbm %s1363_s3, 32  ;;  %s1052_s23 = int_to_ptr.hbm [resolvable:$true] %s1051_s23 }
  0x38   : > { %s1053_s29 = scalar_lea.hbm %s1052_s23, 16  ;;  %p1058_p7 = scmp.lt.s32.totalorder %s1052_s23, %s1363_s3 }
  0x39   : > { %v302_v14 = vld [vmem:[#allocation1] sm:$0xff]  ;;  %v303_v15 = vld [vmem:[#allocation1 + $0x9] sm:$0xff]  ;;  %p1054_p4 = scmp.ne.s32.totalorder %s1052_s23, %s1053_s29  ;;  %p1059_p8 = scmp.lt.s32.totalorder %s1057_s28, %s1053_s29 }
  0x3a   : > { %882 = vmatpush.msk.msra.mxu2 %vm246_vm0, %v302_v14  ;;  %884 = vmatpush.msk.msra.mxu3 %vm246_vm0, %v303_v15  ;;  %371 = vst [vmem:[#allocation1] ss:$9 sm:$0xff] %v890_v11 }
  0x3b   : > { %883 = vmatmul.msk.f32.vlgmr.msra.gmra.mxu2 %vm242_vm1, %v1251_v12  ;;  %885 = vmatmul.msk.f32.vlgmr.msra.gmra.mxu3 %vm242_vm1, %v1251_v12  ;;  %373 = vst [vmem:[#allocation1 + $0x1] ss:$9 sm:$0xff] %v891_v13  ;;  %p1055_p5 = pnand %p1054_p4, %p1195_p9  ;;  %p1060_p10 = por %p1059_p8, %p1058_p7 }
  0x3c   : > { %375 = vst [vmem:[#allocation1 + $0x2] ss:$9 sm:$0xff] %v892_v16 }
  0x3d   : > { %377 = vst [vmem:[#allocation1 + $0x3] ss:$9 sm:$0xff] %v893_v17  ;;  %p1056_p6 = pneg %p1055_p5 }
  0x3f   : > { %p1061_p13 = pnand %p1060_p10, %p1056_p6 }
  0x44   : > { %v378_v21 = vld [vmem:[#allocation1] sm:$0xff]  ;;  %v379_v22 = vld [vmem:[#allocation1 + $0x9] sm:$0xff] }
  0x45   : > { %428 = vst [vmem:[#allocation1] ss:$9 sm:$0xff] %v886_v18  ;;  %894 = vmatpush.msk.msrb.mxu0 %vm246_vm0, %v378_v21  ;;  %896 = vmatpush.msk.msrb.mxu1 %vm246_vm0, %v379_v22 }
  0x46   : > { %430 = vst [vmem:[#allocation1 + $0x1] ss:$9 sm:$0xff] %v887_v19  ;;  %895 = vmatmul.msk.f32.vlgmr.msrb.gmra.mxu0 %vm242_vm1, %v1237_v6  ;;  %897 = vmatmul.msk.f32.vlgmr.msrb.gmra.mxu1 %vm242_vm1, %v1237_v6 }
  0x47   : > { %432 = vst [vmem:[#allocation1 + $0x2] ss:$9 sm:$0xff] %v888_v20 }
  0x48   : > { %434 = vst [vmem:[#allocation1 + $0x3] ss:$9 sm:$0xff] %v889_v23 }
  0x4f   : > { %v435_v26 = vld [vmem:[#allocation1] sm:$0xff]  ;;  %v436_v27 = vld [vmem:[#allocation1 + $0x9] sm:$0xff] }
  0x50   : > { %898 = vmatpush.msk.msrb.mxu2 %vm246_vm0, %v435_v26  ;;  %900 = vmatpush.msk.msrb.mxu3 %vm246_vm0, %v436_v27  ;;  %503 = vst [vmem:[#allocation1] ss:$9 sm:$0xff] %v906_v24 }
  0x51   : > { %899 = vmatmul.msk.f32.vlgmr.msrb.gmra.mxu2 %vm242_vm1, %v1251_v12  ;;  %901 = vmatmul.msk.f32.vlgmr.msrb.gmra.mxu3 %vm242_vm1, %v1251_v12  ;;  %505 = vst [vmem:[#allocation1 + $0x1] ss:$9 sm:$0xff] %v907_v25 }
  0x52   : > { %507 = vst [vmem:[#allocation1 + $0x2] ss:$9 sm:$0xff] %v908_v28 }
  0x53   : > { %509 = vst [vmem:[#allocation1 + $0x3] ss:$9 sm:$0xff] %v909_v29 }
  0x5a   : > { %v510_v33 = vld [vmem:[#allocation1] sm:$0xff]  ;;  %v511_v34 = vld [vmem:[#allocation1 + $0x9] sm:$0xff] }
  0x5b   : > { %560 = vst [vmem:[#allocation1] ss:$9 sm:$0xff] %v902_v30  ;;  %910 = vmatpush.msk.msra.mxu0 %vm246_vm0, %v510_v33  ;;  %912 = vmatpush.msk.msra.mxu1 %vm246_vm0, %v511_v34 }
  0x5c   : > { %562 = vst [vmem:[#allocation1 + $0x1] ss:$9 sm:$0xff] %v903_v31  ;;  %911 = vmatmul.msk.f32.vlgmr.msra.gmra.mxu0 %vm242_vm1, %v1237_v6  ;;  %913 = vmatmul.msk.f32.vlgmr.msra.gmra.mxu1 %vm242_vm1, %v1237_v6 }
  0x5d   : > { %564 = vst [vmem:[#allocation1 + $0x2] ss:$9 sm:$0xff] %v904_v32 }
  0x5e   : > { %566 = vst [vmem:[#allocation1 + $0x3] ss:$9 sm:$0xff] %v905_v35 }
  0x65   : > { %v567_v40 = vld [vmem:[#allocation1] sm:$0xff]  ;;  %v568_v41 = vld [vmem:[#allocation1 + $0x9] sm:$0xff] }
  0x66   : > { %914 = vmatpush.msk.msra.mxu2 %vm246_vm0, %v567_v40  ;;  %916 = vmatpush.msk.msra.mxu3 %vm246_vm0, %v568_v41  ;;  %635 = vst [vmem:[#allocation1] ss:$9 sm:$0xff] %v922_v38 }
  0x67   : > { %637 = vst [vmem:[#allocation1 + $0x1] ss:$9 sm:$0xff] %v923_v39  ;;  %915 = vmatmul.msk.f32.vlgmr.msra.gmra.mxu2 %vm242_vm1, %v1251_v12  ;;  %917 = vmatmul.msk.f32.vlgmr.msra.gmra.mxu3 %vm242_vm1, %v1251_v12 }
  0x68   : > { %639 = vst [vmem:[#allocation1 + $0x2] ss:$9 sm:$0xff] %v924_v42 }
  0x69   : > { %641 = vst [vmem:[#allocation1 + $0x3] ss:$9 sm:$0xff] %v925_v43 }
  0x70   : > { %v642_v46 = vld [vmem:[#allocation1] sm:$0xff]  ;;  %v643_v47 = vld [vmem:[#allocation1 + $0x9] sm:$0xff] }
  0x71   : > { %692 = vst [vmem:[#allocation1] ss:$9 sm:$0xff] %v918_v44  ;;  %926 = vmatpush.msk.msrb.mxu0 %vm246_vm0, %v642_v46  ;;  %928 = vmatpush.msk.msrb.mxu1 %vm246_vm0, %v643_v47 }
  0x72   : > { %694 = vst [vmem:[#allocation1 + $0x1] ss:$9 sm:$0xff] %v919_v45  ;;  %927 = vmatmul.msk.f32.vlgmr.msrb.gmra.mxu0 %vm242_vm1, %v1237_v6  ;;  %929 = vmatmul.msk.f32.vlgmr.msrb.gmra.mxu1 %vm242_vm1, %v1237_v6 }
  0x73   : > { %696 = vst [vmem:[#allocation1 + $0x2] ss:$9 sm:$0xff] %v920_v48 }
  0x74   : > { %698 = vst [vmem:[#allocation1 + $0x3] ss:$9 sm:$0xff] %v921_v49 }
  0x7b   : > { %v699_v50 = vld [vmem:[#allocation1] sm:$0xff]  ;;  %v700_v51 = vld [vmem:[#allocation1 + $0x9] sm:$0xff] }
  0x7c   : > { %930 = vmatpush.msk.msrb.mxu2 %vm246_vm0, %v699_v50  ;;  %932 = vmatpush.msk.msrb.mxu3 %vm246_vm0, %v700_v51 }
  0x7d   : > { %931 = vmatmul.msk.f32.vlgmr.msrb.gmra.mxu2 %vm242_vm1, %v1251_v12  ;;  %933 = vmatmul.msk.f32.vlgmr.msrb.gmra.mxu3 %vm242_vm1, %v1251_v12 }
  0x9a   : > { %v751_v16 = vpop.permute.xlu0 %750 }
  0xad   : > { %v268_v52 = vpop.f32.mrf.mxu0  ;;  %v288_v53 = vpop.f32.mrf.mxu1 }
  0xbe   : > { %v328_v54 = vpop.f32.mrf.mxu2  ;;  %v348_v55 = vpop.f32.mrf.mxu3 }
  0xbf   : > { %v329_v0 = vadd.f32 %v328_v54, %v268_v52  ;;  %v349_v1 = vadd.f32 %v348_v55, %v288_v53 }
  0xc3   : > { %v401_v56 = vpop.f32.mrf.mxu0  ;;  %v421_v57 = vpop.f32.mrf.mxu1 }
  0xd4   : > { %v458_v58 = vpop.f32.mrf.mxu2  ;;  %v478_v59 = vpop.f32.mrf.mxu3 }
  0xd5   : > { %v459_v2 = vadd.f32 %v458_v58, %v401_v56  ;;  %v479_v3 = vadd.f32 %v478_v59, %v421_v57 }
  0xd7   : > { %v481_v8 = vmax.f32 %v329_v0, %v459_v2  ;;  %v482_v9 = vmax.f32 %v349_v1, %v479_v3 }
  0xd9   : > { %v533_v60 = vpop.f32.mrf.mxu0  ;;  %v553_v61 = vpop.f32.mrf.mxu1 }
  0xea   : > { %v590_v62 = vpop.f32.mrf.mxu2  ;;  %v610_v63 = vpop.f32.mrf.mxu3 }
  0xeb   : > { %v591_v4 = vadd.f32 %v590_v62, %v533_v60  ;;  %v611_v5 = vadd.f32 %v610_v63, %v553_v61 }
  0xed   : > { %v613_v12 = vmax.f32 %v481_v8, %v591_v4  ;;  %v614_v13 = vmax.f32 %v482_v9, %v611_v5 }
  0xef   : > { %v665_v6 = vpop.f32.mrf.mxu0  ;;  %v685_v7 = vpop.f32.mrf.mxu1 }
 0x100   : > { %v722_v10 = vpop.f32.mrf.mxu2  ;;  %v742_v11 = vpop.f32.mrf.mxu3 }
 0x101   : > { %v723_v14 = vadd.f32 %v722_v10, %v665_v6  ;;  %v743_v15 = vadd.f32 %v742_v11, %v685_v7 }
 0x103   : > { %v745_v17 = vmax.f32 %v613_v12, %v723_v14  ;;  %v746_v18 = vmax.f32 %v614_v13, %v743_v15 }
 0x105   : > { %v753_v19 = vadd.f32 %v751_v16, %v745_v17  ;;  %v754_v20 = vadd.f32 %v751_v16, %v746_v18 }
 0x107   : > { %755 = vst [vmem:[%s208_s15] sm:$0xff] %v753_v19 }
 0x108   : > { %756 = vst [vmem:[%s208_s15 + $0x8] sm:$0xff] %v754_v20 }
 0x109   : > { %1064 = shalt.err (!%p1061_p13)
}
 0x10a   : > { %943 = dma.vmem_to_hbm [thread:$0]  (%p1195_p9), %s774_s11, 256, %s776_s18, %s758_s21  }
 0x10b PF: > { %s787_s19 = sand.u32 1, %s1099_s12   ;;  %p950_p0 = pnand %p863_p12, %p1202_p11 }
 0x10c   : > { %s788_s5 = scalar_lea.sflag [#allocation4], %s787_s19 }
 0x10d   : > { %p951_p1 = pneg %p950_p0 }
 0x10f   : > { %1094 = dma.done.wait (%p951_p1), %s788_s5, 256  }
 0x110   : > { %1096 = vsyncadd (%p951_p1), %s788_s5, 4294967040  ;;  %s19_s17 = sadd.s32 1, %s1119_s17   ;;  %s1368_s12 = smov %s1103_s13 }
 0x111   : > { %p16_p2 = scmp.ge.s32.totalorder %s19_s17, 4   ;;  %s1369_s13 = smov %s1107_s14 }
 0x112   : > { %s1370_s14 = smov %s1200_s26  ;;  %s1371_s15 = smov %s1115_s16 }
 0x113   : > { %s1372_s16 = smov %s1374_s20  ;;  %18 = sbr.rel (!%p16_p2) target bundleno = 6 (0x6), region = 133 }
 0x118   :  { %794 = vsyncpa [#allocation3], 1 }
 0x119   :  { %796 = vsyncpa [#allocation3 + $0x1], 1 }
 0x11a   :  { %797 = vsyncpa [#allocation4], 1 }
 0x11b   :  { %799 = vsyncpa [#allocation4 + $0x1], 1 }

</bundles_post_ra>
